<compile_context>
chip_gen: v7x
topology: tpu7x:2x2x1
jax: 0.10.0
libtpu: 0.0.40
codegen_flags: <defaults>
</compile_context>

<pallas_src>
import math

import jax
import jax.numpy as jnp
from jax.experimental import pallas as pl
from jax.experimental.pallas import tpu as pltpu


def _pointwise_body(w_ref, b_ref, x_ref, r_ref, o_ref):
    # w_ref: SMEM (C_out, C_in) f32     b_ref: SMEM (C_out,) f32
    # x_ref: VMEM (1, C_in,  ROWS, 128) o_ref: VMEM (1, C_out, ROWS, 128)
    # r_ref: VMEM (1, C_out, ROWS, 128) or None (fused residual add)
    c_in = x_ref.shape[1]
    c_out = o_ref.shape[1]
    xs = [x_ref[0, c].astype(jnp.float32) for c in range(c_in)]
    for o in range(c_out):
        acc = xs[0] * w_ref[o, 0]
        for c in range(1, c_in):
            acc = acc + xs[c] * w_ref[o, c]
        acc = acc + b_ref[o]
        if r_ref is not None:
            acc = acc + r_ref[0, o].astype(jnp.float32)
        o_ref[0, o] = acc.astype(o_ref.dtype)


def _kernel_no_res(w_ref, b_ref, x_ref, o_ref):
    _pointwise_body(w_ref, b_ref, x_ref, None, o_ref)


def _kernel_res(w_ref, b_ref, x_ref, r_ref, o_ref):
    _pointwise_body(w_ref, b_ref, x_ref, r_ref, o_ref)


@jax.jit
def pointwise_conv3d(x, weight, bias=None, residual=None):
    """1x1x1 Conv3d forward (outconv / RDB.conv_1x1) with optional fused residual.

    x:        (N, C_in, D, H, W)
    weight:   (C_out, C_in, 1, 1, 1)
    bias:     (C_out,) or None              (RDB.conv_1x1 has bias=False)
    residual: (N, C_out, D, H, W) or None   (fuses RDB's `+ x`)
    returns   (N, C_out, D, H, W)
    """
    n, c_in, d, h, w = x.shape
    c_out = weight.shape[0]
    l = d * h * w
    itemsize = jnp.dtype(x.dtype).itemsize

    # ---- host-side views: spatial axis as dense (ROWS, 128) channel planes ----
    rows = pl.cdiv(l, 128)
    l_pad = rows * 128
    x3 = x.reshape(n, c_in, l)
    if l_pad != l:
        x3 = jnp.pad(x3, ((0, 0), (0, 0), (0, l_pad - l)))
    x4 = x3.reshape(n, c_in, rows, 128)

    res4 = None
    if residual is not None:
        res3 = residual.reshape(n, c_out, l)
        if l_pad != l:
            res3 = jnp.pad(res3, ((0, 0), (0, 0), (0, l_pad - l)))
        res4 = res3.reshape(n, c_out, rows, 128)

    w2 = weight.reshape(c_out, c_in).astype(jnp.float32)            # SMEM scalars
    b1 = (bias if bias is not None
          else jnp.zeros((c_out,), jnp.float32)).astype(jnp.float32)

    # ---- adaptive row tile: amortize per-step overhead, stay inside VMEM, ----
    # ---- and keep >=2 grid blocks for megacore / v7x's two TensorCores.    ----
    n_planes = c_in + c_out + (c_out if residual is not None else 0)
    vmem_budget = 40 << 20                  # conservative cap (v7x: 64 MiB per TC)
    rows_cap = max(8, vmem_budget // (2 * n_planes * 128 * itemsize))
    tile_rows = min(rows, rows_cap)
    num_blocks = n * math.ceil(rows / tile_rows)
    if num_blocks < 4:                      # aim for >=4 blocks of work total
        want = max(1, math.ceil(4 / n))
        tile_rows = min(tile_rows, max(1, math.ceil(rows / want)))
    if tile_rows < rows:
        tile_rows = max(8, (tile_rows // 8) * 8)   # sublane-aligned partial tiles
        if tile_rows >= rows:
            tile_rows = rows

    grid = (n, pl.cdiv(rows, tile_rows))

    needed = 2 * n_planes * tile_rows * 128 * itemsize
    vmem_limit = int(min(48 << 20, max(needed + (4 << 20), 8 << 20)))

    smem = pl.BlockSpec(memory_space=pltpu.MemorySpace.SMEM)
    x_spec = pl.BlockSpec((1, c_in, tile_rows, 128), lambda ni, ri: (ni, 0, ri, 0))
    o_spec = pl.BlockSpec((1, c_out, tile_rows, 128), lambda ni, ri: (ni, 0, ri, 0))

    in_specs = [smem, smem, x_spec]
    args = [w2, b1, x4]
    kernel = _kernel_no_res
    if res4 is not None:
        in_specs.append(
            pl.BlockSpec((1, c_out, tile_rows, 128), lambda ni, ri: (ni, 0, ri, 0)))
        args.append(res4)
        kernel = _kernel_res

    extra_rw = 2 if residual is not None else 1
    cost = pl.CostEstimate(
        flops=2 * n * c_out * c_in * l + extra_rw * n * c_out * l,
        transcendentals=0,
        bytes_accessed=(n * c_in * l + extra_rw * n * c_out * l) * itemsize
        + (c_out * c_in + c_out) * 4,
    )

    y4 = pl.pallas_call(
        kernel,
        out_shape=jax.ShapeDtypeStruct((n, c_out, rows, 128), x.dtype),
        grid=grid,
        in_specs=in_specs,
        out_specs=o_spec,
        compiler_params=pltpu.CompilerParams(
            dimension_semantics=("parallel", "parallel"),
            vmem_limit_bytes=vmem_limit,
        ),
        cost_estimate=cost,
    )(*args)

    y3 = y4.reshape(n, c_out, l_pad)
    if l_pad != l:
        y3 = y3[:, :, :l]
    return y3.reshape(n, c_out, d, h, w)


if __name__ == "__main__":
    key = jax.random.PRNGKey(0)
    k_x, k_w, k_b, k_r = jax.random.split(key, 4)

    N, C_IN, C_OUT, D, H, W = 2, 4, 3, 4, 16, 16          # L = D*H*W = 1024
    x = jax.random.normal(k_x, (N, C_IN, D, H, W), dtype=jnp.float32)
    weight = jax.random.normal(k_w, (C_OUT, C_IN, 1, 1, 1), dtype=jnp.float32) * 0.1
    bias = jax.random.normal(k_b, (C_OUT,), dtype=jnp.float32) * 0.1
    w2 = weight.reshape(C_OUT, C_IN)

    # ---- outconv path: conv 1x1x1 with bias ----
    y_ref = jnp.einsum("ncdhw,oc->nodhw", x, w2) + bias.reshape(1, C_OUT, 1, 1, 1)
    y = jax.block_until_ready(pointwise_conv3d(x, weight, bias))
    assert y.shape == (N, C_OUT, D, H, W)
    assert jnp.allclose(y, y_ref, atol=1e-5, rtol=1e-5)

    # ---- RDB.conv_1x1 path: no bias, fused residual add (out = conv(x) + res) ----
    resid = jax.random.normal(k_r, (N, C_OUT, D, H, W), dtype=jnp.float32)
    y2_ref = jnp.einsum("ncdhw,oc->nodhw", x, w2) + resid
    y2 = jax.block_until_ready(pointwise_conv3d(x, weight, None, residual=resid))
    assert jnp.allclose(y2, y2_ref, atol=1e-5, rtol=1e-5)

    # ---- non-multiple-of-128 spatial extent: exercises pad + tail slice ----
    x3 = jax.random.normal(k_x, (1, C_IN, 3, 10, 10), dtype=jnp.float32)  # L = 300
    y3_ref = jnp.einsum("ncdhw,oc->nodhw", x3, w2) + bias.reshape(1, C_OUT, 1, 1, 1)
    y3 = jax.block_until_ready(pointwise_conv3d(x3, weight, bias))
    assert jnp.allclose(y3, y3_ref, atol=1e-5, rtol=1e-5)

    print("KERNEL_OK")
</pallas_src>

<mosaic_0001>
module attributes {stable_mosaic.version = 11 : i64} {
  func.func @_kernel_no_res(%arg0: i32, %arg1: i32, %arg2: memref<3x4xf32, #tpu.memory_space<smem>>, %arg3: memref<3xf32, #tpu.memory_space<smem>>, %arg4: memref<1x4x8x128xf32, #tpu.memory_space<vmem>>, %arg5: memref<1x3x8x128xf32, #tpu.memory_space<vmem>>) attributes {dimension_semantics = [#tpu.dimension_semantics<parallel>, #tpu.dimension_semantics<parallel>], iteration_bounds = array<i64: 2, 1>, scalar_prefetch = 0 : i64, scratch_operands = 0 : i64, tpu.core_type = #tpu.core_type<tc>, window_params = [{transform_indices = @transform_0, window_bounds = array<i64: 3, 4>}, {transform_indices = @transform_1, window_bounds = array<i64: 3>}, {transform_indices = @transform_2, window_bounds = array<i64: 1, 4, 8, 128>}, {transform_indices = @transform_3, window_bounds = array<i64: 1, 3, 8, 128>}]} {
    %c0 = arith.constant 0 : index
    %c0_0 = arith.constant 0 : index
    %c0_1 = arith.constant 0 : index
    %c0_2 = arith.constant 0 : index
    %0 = vector.load %arg4[%c0, %c0_0, %c0_1, %c0_2] : memref<1x4x8x128xf32, #tpu.memory_space<vmem>>, vector<1x1x8x128xf32>
    %1 = vector.shape_cast %0 : vector<1x1x8x128xf32> to vector<8x128xf32>
    %c0_3 = arith.constant 0 : index
    %c1 = arith.constant 1 : index
    %c0_4 = arith.constant 0 : index
    %c0_5 = arith.constant 0 : index
    %2 = vector.load %arg4[%c0_3, %c1, %c0_4, %c0_5] : memref<1x4x8x128xf32, #tpu.memory_space<vmem>>, vector<1x1x8x128xf32>
    %3 = vector.shape_cast %2 : vector<1x1x8x128xf32> to vector<8x128xf32>
    %c0_6 = arith.constant 0 : index
    %c2 = arith.constant 2 : index
    %c0_7 = arith.constant 0 : index
    %c0_8 = arith.constant 0 : index
    %4 = vector.load %arg4[%c0_6, %c2, %c0_7, %c0_8] : memref<1x4x8x128xf32, #tpu.memory_space<vmem>>, vector<1x1x8x128xf32>
    %5 = vector.shape_cast %4 : vector<1x1x8x128xf32> to vector<8x128xf32>
    %c0_9 = arith.constant 0 : index
    %c3 = arith.constant 3 : index
    %c0_10 = arith.constant 0 : index
    %c0_11 = arith.constant 0 : index
    %6 = vector.load %arg4[%c0_9, %c3, %c0_10, %c0_11] : memref<1x4x8x128xf32, #tpu.memory_space<vmem>>, vector<1x1x8x128xf32>
    %7 = vector.shape_cast %6 : vector<1x1x8x128xf32> to vector<8x128xf32>
    %c0_12 = arith.constant 0 : index
    %c0_13 = arith.constant 0 : index
    %8 = memref.load %arg2[%c0_12, %c0_13] : memref<3x4xf32, #tpu.memory_space<smem>>
    %9 = vector.broadcast %8 : f32 to vector<8x128xf32>
    %10 = arith.mulf %1, %9 : vector<8x128xf32>
    %c0_14 = arith.constant 0 : index
    %c1_15 = arith.constant 1 : index
    %11 = memref.load %arg2[%c0_14, %c1_15] : memref<3x4xf32, #tpu.memory_space<smem>>
    %12 = vector.broadcast %11 : f32 to vector<8x128xf32>
    %13 = arith.mulf %3, %12 : vector<8x128xf32>
    %14 = arith.addf %10, %13 : vector<8x128xf32>
    %c0_16 = arith.constant 0 : index
    %c2_17 = arith.constant 2 : index
    %15 = memref.load %arg2[%c0_16, %c2_17] : memref<3x4xf32, #tpu.memory_space<smem>>
    %16 = vector.broadcast %15 : f32 to vector<8x128xf32>
    %17 = arith.mulf %5, %16 : vector<8x128xf32>
    %18 = arith.addf %14, %17 : vector<8x128xf32>
    %c0_18 = arith.constant 0 : index
    %c3_19 = arith.constant 3 : index
    %19 = memref.load %arg2[%c0_18, %c3_19] : memref<3x4xf32, #tpu.memory_space<smem>>
    %20 = vector.broadcast %19 : f32 to vector<8x128xf32>
    %21 = arith.mulf %7, %20 : vector<8x128xf32>
    %22 = arith.addf %18, %21 : vector<8x128xf32>
    %c0_20 = arith.constant 0 : index
    %23 = memref.load %arg3[%c0_20] : memref<3xf32, #tpu.memory_space<smem>>
    %24 = vector.broadcast %23 : f32 to vector<8x128xf32>
    %25 = arith.addf %22, %24 : vector<8x128xf32>
    %c0_21 = arith.constant 0 : index
    %c0_22 = arith.constant 0 : index
    %c0_23 = arith.constant 0 : index
    %c0_24 = arith.constant 0 : index
    %26 = vector.load %arg5[%c0_21, %c0_22, %c0_23, %c0_24] : memref<1x3x8x128xf32, #tpu.memory_space<vmem>>, vector<1x1x8x128xf32>
    %27 = vector.shape_cast %26 : vector<1x1x8x128xf32> to vector<8x128xf32>
    %28 = vector.shape_cast %25 : vector<8x128xf32> to vector<1x1x8x128xf32>
    tpu.vector_store %arg5[%c0_21, %c0_22, %c0_23, %c0_24], %28 {strides = array<i32>} : memref<1x3x8x128xf32, #tpu.memory_space<vmem>>, vector<1x1x8x128xf32>,
    %c1_25 = arith.constant 1 : index
    %c0_26 = arith.constant 0 : index
    %29 = memref.load %arg2[%c1_25, %c0_26] : memref<3x4xf32, #tpu.memory_space<smem>>
    %30 = vector.broadcast %29 : f32 to vector<8x128xf32>
    %31 = arith.mulf %1, %30 : vector<8x128xf32>
    %c1_27 = arith.constant 1 : index
    %c1_28 = arith.constant 1 : index
    %32 = memref.load %arg2[%c1_27, %c1_28] : memref<3x4xf32, #tpu.memory_space<smem>>
    %33 = vector.broadcast %32 : f32 to vector<8x128xf32>
    %34 = arith.mulf %3, %33 : vector<8x128xf32>
    %35 = arith.addf %31, %34 : vector<8x128xf32>
    %c1_29 = arith.constant 1 : index
    %c2_30 = arith.constant 2 : index
    %36 = memref.load %arg2[%c1_29, %c2_30] : memref<3x4xf32, #tpu.memory_space<smem>>
    %37 = vector.broadcast %36 : f32 to vector<8x128xf32>
    %38 = arith.mulf %5, %37 : vector<8x128xf32>
    %39 = arith.addf %35, %38 : vector<8x128xf32>
    %c1_31 = arith.constant 1 : index
    %c3_32 = arith.constant 3 : index
    %40 = memref.load %arg2[%c1_31, %c3_32] : memref<3x4xf32, #tpu.memory_space<smem>>
    %41 = vector.broadcast %40 : f32 to vector<8x128xf32>
    %42 = arith.mulf %7, %41 : vector<8x128xf32>
    %43 = arith.addf %39, %42 : vector<8x128xf32>
    %c1_33 = arith.constant 1 : index
    %44 = memref.load %arg3[%c1_33] : memref<3xf32, #tpu.memory_space<smem>>
    %45 = vector.broadcast %44 : f32 to vector<8x128xf32>
    %46 = arith.addf %43, %45 : vector<8x128xf32>
    %c0_34 = arith.constant 0 : index
    %c1_35 = arith.constant 1 : index
    %c0_36 = arith.constant 0 : index
    %c0_37 = arith.constant 0 : index
    %47 = vector.load %arg5[%c0_34, %c1_35, %c0_36, %c0_37] : memref<1x3x8x128xf32, #tpu.memory_space<vmem>>, vector<1x1x8x128xf32>
    %48 = vector.shape_cast %47 : vector<1x1x8x128xf32> to vector<8x128xf32>
    %49 = vector.shape_cast %46 : vector<8x128xf32> to vector<1x1x8x128xf32>
    tpu.vector_store %arg5[%c0_34, %c1_35, %c0_36, %c0_37], %49 {strides = array<i32>} : memref<1x3x8x128xf32, #tpu.memory_space<vmem>>, vector<1x1x8x128xf32>,
    %c2_38 = arith.constant 2 : index
    %c0_39 = arith.constant 0 : index
    %50 = memref.load %arg2[%c2_38, %c0_39] : memref<3x4xf32, #tpu.memory_space<smem>>
    %51 = vector.broadcast %50 : f32 to vector<8x128xf32>
    %52 = arith.mulf %1, %51 : vector<8x128xf32>
    %c2_40 = arith.constant 2 : index
    %c1_41 = arith.constant 1 : index
    %53 = memref.load %arg2[%c2_40, %c1_41] : memref<3x4xf32, #tpu.memory_space<smem>>
    %54 = vector.broadcast %53 : f32 to vector<8x128xf32>
    %55 = arith.mulf %3, %54 : vector<8x128xf32>
    %56 = arith.addf %52, %55 : vector<8x128xf32>
    %c2_42 = arith.constant 2 : index
    %c2_43 = arith.constant 2 : index
    %57 = memref.load %arg2[%c2_42, %c2_43] : memref<3x4xf32, #tpu.memory_space<smem>>
    %58 = vector.broadcast %57 : f32 to vector<8x128xf32>
    %59 = arith.mulf %5, %58 : vector<8x128xf32>
    %60 = arith.addf %56, %59 : vector<8x128xf32>
    %c2_44 = arith.constant 2 : index
    %c3_45 = arith.constant 3 : index
    %61 = memref.load %arg2[%c2_44, %c3_45] : memref<3x4xf32, #tpu.memory_space<smem>>
    %62 = vector.broadcast %61 : f32 to vector<8x128xf32>
    %63 = arith.mulf %7, %62 : vector<8x128xf32>
    %64 = arith.addf %60, %63 : vector<8x128xf32>
    %c2_46 = arith.constant 2 : index
    %65 = memref.load %arg3[%c2_46] : memref<3xf32, #tpu.memory_space<smem>>
    %66 = vector.broadcast %65 : f32 to vector<8x128xf32>
    %67 = arith.addf %64, %66 : vector<8x128xf32>
    %c0_47 = arith.constant 0 : index
    %c2_48 = arith.constant 2 : index
    %c0_49 = arith.constant 0 : index
    %c0_50 = arith.constant 0 : index
    %68 = vector.load %arg5[%c0_47, %c2_48, %c0_49, %c0_50] : memref<1x3x8x128xf32, #tpu.memory_space<vmem>>, vector<1x1x8x128xf32>
    %69 = vector.shape_cast %68 : vector<1x1x8x128xf32> to vector<8x128xf32>
    %70 = vector.shape_cast %67 : vector<8x128xf32> to vector<1x1x8x128xf32>
    tpu.vector_store %arg5[%c0_47, %c2_48, %c0_49, %c0_50], %70 {strides = array<i32>} : memref<1x3x8x128xf32, #tpu.memory_space<vmem>>, vector<1x1x8x128xf32>,
    return
  }
  func.func @transform_0(%arg0: i32, %arg1: i32) -> (i32, i32) {
    %c0_i32 = arith.constant 0 : i32
    %c0_i32_0 = arith.constant 0 : i32
    %c0_i32_1 = arith.constant 0 : i32
    return %c0_i32, %c0_i32_0 : i32, i32
  }
  func.func @transform_1(%arg0: i32, %arg1: i32) -> i32 {
    %c0_i32 = arith.constant 0 : i32
    %c0_i32_0 = arith.constant 0 : i32
    return %c0_i32 : i32
  }
  func.func @transform_2(%arg0: i32, %arg1: i32) -> (i32, i32, i32, i32) {
    %c0_i32 = arith.constant 0 : i32
    %c0_i32_0 = arith.constant 0 : i32
    %c0_i32_1 = arith.constant 0 : i32
    return %arg0, %c0_i32, %arg1, %c0_i32_0 : i32, i32, i32, i32
  }
  func.func @transform_3(%arg0: i32, %arg1: i32) -> (i32, i32, i32, i32) {
    %c0_i32 = arith.constant 0 : i32
    %c0_i32_0 = arith.constant 0 : i32
    %c0_i32_1 = arith.constant 0 : i32
    return %arg0, %c0_i32, %arg1, %c0_i32_0 : i32, i32, i32, i32
  }
}

</mosaic_0001>

<bundles_post_ra>
// kernel: pointwise_conv3d.1
= control target key start
LH: loop header
LB: loop body
LE: loop exit
PB: predicated region body
PF: predicated region fallthrough
CT: control target
= control target key end

     0   :  { %8 = vsyncpa [#allocation3], 0  ;;  %s650_s0 = inlined_call_operand.vmem [shape: f32[3,4], index: 0, kind: input, shape index: {}]   ;;  %s651_s1 = inlined_call_operand.vmem [shape: f32[3], index: 1, kind: input, shape index: {}]   ;;  %s652_s2 = inlined_call_operand.vmem [shape: f32[2,4,8,128], index: 2, kind: input, shape index: {}]   ;;  %s653_s3 = inlined_call_operand.vmem [shape: f32[2,3,8,128], index: 3, kind: output, shape index: {}]  }
   0x1   :  { %9 = vsyncpa [#allocation5], 0  ;;  %s564_s12 = smov 0   ;;  %s566_s13 = smov 0  }
   0x2   :  { %s568_s14 = smov 0  }
   0x3 LB: > { %s401_s15 = sadd.s32 4294967295, %s540_s14   ;;  %s27_s16 = sadd.s32 1, %s536_s13  ;;  %s540_s14 = sphi %s568_s14, %s15_s14   ;;  %s536_s13 = sphi %s566_s13, %s663_s13   ;;  %s532_s12 = sphi %s564_s12, %s662_s12  }
   0x4   : > { %p29_p0 = scmp.ge.s32.totalorder %s27_s16, 2  ;;  %p403_p1 = scmp.ge.s32.totalorder %s540_s14, 1 }
   0x5   : > { %p130_p2 = scmp.lt.s32.totalorder %s540_s14, 3  ;;  %p589_p4 = scmp.eq.s32.totalorder %s401_s15, 0 }
   0x6   : > { %s665_s16 = smov (%p29_p0, %s27_s16), 0  ;;  %s143_s21 = sshll.u32 %s650_s0, 4  ;;  %s144_s21 = int_to_ptr.vmem [resolvable:$true] %s143_s21 }
   0x7   : > { %p585_p3 = pnand %p403_p1, %p130_p2  ;;  %s154_s24 = sshll.u32 %s651_s1, 4  ;;  %s155_s24 = int_to_ptr.vmem [resolvable:$true] %s154_s24 }
   0x8   : > { %s658_s18 = scalar_select %p589_p4, 1, 0 }
   0x9   : > { %s657_s17 = scalar_select %p585_p3, 1, 0 }
   0xa   : > { %p443_p5 = pneg %p585_p3  ;;  %s480_s26 = scalar_lea.vmem %s144_s21, 64 }
   0xb   : > { %p481_p7 = scmp.ne.s32.totalorder %s144_s21, %s480_s26  ;;  %p488_p11 = scmp.lt.s32.totalorder %s144_s21, %s144_s21 }
   0xc   : > { %p603_p6 = pnand %p589_p4, %p443_p5  ;;  %p489_p12 = scmp.lt.s32.totalorder %s480_s26, %s480_s26 }
   0xe   : > { %p482_p8 = pneg %p603_p6  ;;  %p490_p13 = por %p489_p12, %p488_p11 }
  0x10   : > { %p483_p9 = pnand %p482_p8, %p481_p7 }
  0x12   : > { %p484_p10 = pneg %p483_p9 }
  0x14   : > { %p491_p0 = pnand %p490_p13, %p484_p10 }
  0x16   : > { %494 = shalt.err (!%p491_p0)
}
  0x17   : > { %s542_s27 = smov [#allocation2]   ;;  %s495_s28 = scalar_lea.vmem %s155_s24, 16 }
  0x18   : > { %446 = dma.vmem_to_smem (!%p603_p6), %s144_s21, 64, %s542_s27, [#allocation3]  }
  0x19   : > { %p496_p1 = scmp.ne.s32.totalorder %s155_s24, %s495_s28  ;;  %p503_p4 = scmp.lt.s32.totalorder %s155_s24, %s155_s24 }
  0x1a   : > { %p504_p3 = scmp.lt.s32.totalorder %s495_s28, %s495_s28 }
  0x1b   : > { %p498_p2 = pnand %p496_p1, %p482_p8 }
  0x1c   : > { %p505_p7 = por %p504_p3, %p503_p4 }
  0x1d   : > { %p499_p5 = pneg %p498_p2 }
  0x1f   : > { %p506_p9 = pnand %p505_p7, %p499_p5 }
  0x21   : > { %509 = shalt.err (!%p506_p9)
}
  0x22   : > { %s543_s29 = smov [#allocation4]   ;;  %p660_p10 = scmp.ne.s32.totalorder %s657_s17, 0 }
  0x23   : > { %449 = dma.vmem_to_smem (!%p603_p6), %s155_s24, 16, %s543_s29, [#allocation5]  }
  0x24   : > { %178 = sbr.rel (%p660_p10) target bundleno = 73 (0x49), region = 32  ;;  %p661_p11 = scmp.ne.s32.totalorder (!%p660_p10), %s658_s18, 0 }
  0x2b   : > { %523 = dma.done.wait (%p661_p11), [#allocation3], 64  }
  0x2c   : > { %525 = vsyncadd (%p661_p11), [#allocation3], 4294967232 }
  0x2d   : > { %527 = dma.done.wait (%p661_p11), [#allocation5], 16  }
  0x2e   : > { %529 = vsyncadd (%p661_p11), [#allocation5], 4294967280 }
  0x2f   : > { %188 = sfence }
  0x30   : > { %p213_p3 = scmp.lt.s32.totalorder %s532_s12, 1  ;;  %s236_s30 = sld [smem:[#allocation2]] }
  0x31   : > { %s416_s4 = sld [smem:[#allocation2 + $0x1]]  ;;  %s417_s5 = sld [smem:[#allocation2 + $0x2]] }
  0x32   : > { %s667_s12 = smov (!%p213_p3, %s532_s12), 1  ;;  %s418_s6 = sld [smem:[#allocation2 + $0x3]] }
  0x33   : > { %s433_s7 = sshll.u32 %s667_s12, 5  ;;  %s628_s8 = sld [smem:[#allocation4]] }
  0x34   : > { %s220_s11 = scalar_lea.vmem %s652_s2, %s433_s7  ;;  %s419_s15 = sld [smem:[#allocation2 + $0x80]] }
  0x35   : > { %v229_v0 = vld [vmem:[%s220_s11] sm:$0xff]  ;;  %v413_v1 = vld [vmem:[%s220_s11 + $0x8] sm:$0xff]  ;;  %v414_v2 = vld [vmem:[%s220_s11 + $0x10] sm:$0xff]  ;;  %s420_s17 = sld [smem:[#allocation2 + $0x81]]  ;;  %s421_s18 = sld [smem:[#allocation2 + $0x82]] }
  0x36   : > { %v237_v3 = vstv %s236_s30  ;;  %v415_v4 = vld [vmem:[%s220_s11 + $0x18] sm:$0xff]  ;;  %s422_s19 = sld [smem:[#allocation2 + $0x83]]  ;;  %s425_s20 = sld [smem:[#allocation2 + $0x100]] }
  0x37   : > { %v238_v5 = vmul.f32 %v237_v3, %v229_v0  ;;  %v240_v6 = vstv %s416_s4  ;;  %v244_v7 = vstv %s417_s5  ;;  %s426_s21 = sld [smem:[#allocation2 + $0x101]]  ;;  %s427_s22 = sld [smem:[#allocation2 + $0x102]] }
  0x38   : > { %v241_v8 = vmul.f32 %v413_v1, %v240_v6  ;;  %v245_v9 = vmul.f32 %v414_v2, %v244_v7  ;;  %v248_v10 = vstv %s418_s6  ;;  %s633_s23 = sld [smem:[#allocation4 + $0x1]]  ;;  %s428_s24 = sld [smem:[#allocation2 + $0x103]] }
  0x39   : > { %v249_v12 = vmul.f32 %v415_v4, %v248_v10  ;;  %s434_s25 = smul.u32 24, %s667_s12  ;;  %v252_v17 = vstv %s628_s8  ;;  %s429_s26 = sld [smem:[#allocation4 + $0x2]] }
  0x3a   : > { %v242_v11 = vadd.f32 %v241_v8, %v238_v5  ;;  %v256_v13 = vstv %s419_s15 }
  0x3b   : > { %v257_v15 = vmul.f32 %v256_v13, %v229_v0  ;;  %v259_v16 = vstv %s420_s17  ;;  %v263_v19 = vstv %s421_s18  ;;  %s228_s29 = scalar_lea.vmem %s653_s3, %s434_s25 }
  0x3c   : > { %v246_v14 = vadd.f32 %v245_v9, %v242_v11  ;;  %v260_v18 = vmul.f32 %v413_v1, %v259_v16  ;;  %v267_v20 = vstv %s422_s19  ;;  %v264_v22 = vmul.f32 %v414_v2, %v263_v19 }
  0x3d   : > { %v268_v23 = vmul.f32 %v415_v4, %v267_v20  ;;  %v276_v25 = vstv %s425_s20  ;;  %v279_v26 = vstv %s426_s21  ;;  %v283_v27 = vstv %s427_s22 }
  0x3e   : > { %v250_v21 = vadd.f32 %v249_v12, %v246_v14  ;;  %v261_v24 = vadd.f32 %v260_v18, %v257_v15  ;;  %v277_v29 = vmul.f32 %v276_v25, %v229_v0  ;;  %v280_v30 = vmul.f32 %v413_v1, %v279_v26 }
  0x3f   : > { %v284_v31 = vmul.f32 %v414_v2, %v283_v27  ;;  %v287_v33 = vstv %s428_s24  ;;  %v271_v34 = vstv %s633_s23  ;;  %v291_v40 = vstv %s429_s26 }
  0x40   : > { %v253_v28 = vadd.f32 %v252_v17, %v250_v21  ;;  %v265_v32 = vadd.f32 %v264_v22, %v261_v24  ;;  %v281_v35 = vadd.f32 %v280_v30, %v277_v29  ;;  %v288_v36 = vmul.f32 %v415_v4, %v287_v33 }
  0x42   : > { %254 = vst [vmem:[%s228_s29] sm:$0xff] %v253_v28  ;;  %v269_v37 = vadd.f32 %v268_v23, %v265_v32  ;;  %v285_v38 = vadd.f32 %v284_v31, %v281_v35 }
  0x44   : > { %v272_v39 = vadd.f32 %v271_v34, %v269_v37  ;;  %v289_v41 = vadd.f32 %v288_v36, %v285_v38 }
  0x46   : > { %424 = vst [vmem:[%s228_s29 + $0x8] sm:$0xff] %v272_v39  ;;  %v292_v42 = vadd.f32 %v291_v40, %v289_v41 }
  0x48   : > { %430 = vst [vmem:[%s228_s29 + $0x10] sm:$0xff] %v292_v42 }
  0x49 PF: > { %s15_s14 = sadd.s32 1, %s540_s14   ;;  %s662_s12 = smov %s536_s13 }
  0x4a   : > { %p12_p4 = scmp.ge.s32.totalorder %s15_s14, 4   ;;  %s663_s13 = smov %s665_s16 }
  0x4c   :  { %14 = sbr.rel (!%p12_p4) target bundleno = 3 (0x3), region = 76 }
  0x53   :  { %322 = vsyncpa [#allocation3], 1 }
  0x54   :  { %324 = vsyncpa [#allocation3 + $0x1], 1 }
  0x55   :  { %325 = vsyncpa [#allocation5], 1 }

</bundles_post_ra>
